<compile_context>
chip_gen: v7x
topology: tpu7x:2x2x1
jax: 0.10.0
libtpu: 0.0.40
codegen_flags: <defaults>
</compile_context>

<pallas_src>
import math

import jax
import jax.numpy as jnp
from jax.experimental import pallas as pl
from jax.experimental.pallas import tpu as pltpu

EPS = 1e-5      # Normalizer eps for float32 (matches the torch path)
TB_MAX = 4096   # max batch-tile rows per grid step


def _mlp_base_kernel(x_ref, mean_ref, w1_ref, b1_ref, w2_ref, b2_ref,
                     vw_ref, vb_ref, actor_ref, value_ref):
    """One batch tile of the fused actor+critic MLP plus value head.

    x_ref    : (TB, Din) f32   raw inputs
    mean_ref : (1, Din)  f32   Normalizer mean (subtracted here, in f32)
    w1_ref   : (Din, 2H) bf16  [Wa1 | Wc1] with inv_std folded in
    b1_ref   : (1, 2H)   f32
    w2_ref   : (2H, 2H)  bf16  blockdiag(Wa2, Wc2)
    b2_ref   : (1, 2H)   f32
    vw_ref   : (1, 2H)   f32   [0 | critic_linear_w^T]
    vb_ref   : (1, 1)    f32   critic_linear bias (SMEM scalar)
    actor_ref: (TB, H)   f32   hidden_actor
    value_ref: (TB, 1)   f32   value
    """
    # Mean subtraction in f32 (numerically safe), then bf16 for the MXU;
    # inv_std is already folded into w1.
    xc = (x_ref[...] - mean_ref[...]).astype(jnp.bfloat16)
    h = jnp.dot(xc, w1_ref[...], preferred_element_type=jnp.float32) + b1_ref[...]
    h = jnp.maximum(h, 0.0)
    h = jnp.dot(h.astype(jnp.bfloat16), w2_ref[...],
                preferred_element_type=jnp.float32) + b2_ref[...]
    h = jnp.maximum(h, 0.0)                          # [actor | critic], (TB, 2H)

    hidden = h.shape[-1] // 2
    actor_ref[...] = h[:, :hidden]

    # critic_linear as VPU mul + cross-lane reduce (vw is zero over the actor
    # half) -- avoids a wasteful N=1 MXU pass.
    value_ref[...] = (jnp.sum(h * vw_ref[...], axis=-1, keepdims=True)
                      + vb_ref[0, 0])


def fuse_params(p):
    """One-time wrapper-side prep: fuse actor/critic into 128-lane-wide
    weights and fold only the multiplicative inv_std of the Normalizer into
    layer 1 (mean stays a separate f32 ref, subtracted in-kernel).  Weights go
    bf16 (MXU operands only); biases / value head stay f32."""
    H = p["actor_w2"].shape[1]
    inv_std = 1.0 / jnp.maximum(p["std"], EPS)                       # (1, Din)
    w1 = jnp.concatenate([p["actor_w1"], p["critic_w1"]], axis=1)    # (Din, 2H)
    b1 = jnp.concatenate([p["actor_b1"], p["critic_b1"]], axis=1)    # (1, 2H)
    w1_folded = inv_std.T * w1     # ((x - mean) * inv_std) @ W1 == (x - mean) @ W1'
    w2 = jnp.zeros((2 * H, 2 * H), jnp.float32)
    w2 = w2.at[:H, :H].set(p["actor_w2"]).at[H:, H:].set(p["critic_w2"])
    b2 = jnp.concatenate([p["actor_b2"], p["critic_b2"]], axis=1)    # (1, 2H)
    vw = jnp.concatenate([jnp.zeros((1, H), jnp.float32),
                          p["critic_linear_w"].T], axis=1)           # (1, 2H)
    return {
        "mean": p["mean"].astype(jnp.float32),
        "w1": w1_folded.astype(jnp.bfloat16),
        "b1": b1.astype(jnp.float32),
        "w2": w2.astype(jnp.bfloat16),
        "b2": b2.astype(jnp.float32),
        "vw": vw.astype(jnp.float32),
        "vb": p["critic_linear_b"].astype(jnp.float32),
    }


@jax.jit
def mlp_base_forward(inputs, rnn_hxs, masks, fused):
    """Pallas MLPBase.forward (non-recurrent): (value, hidden_actor, rnn_hxs)."""
    del masks                    # only used by the recurrent GRU path
    B, din = inputs.shape
    h2 = fused["w2"].shape[0]    # 2 * hidden_size
    hidden = h2 // 2

    # Batch tile: aim for >= 2 grid steps (megacore on v7x + DMA overlap),
    # capped at TB_MAX rows per step, rounded up to a multiple of 8 sublanes.
    n_steps = max(2, -(-B // TB_MAX))
    per_step = -(-B // n_steps)
    tb = max(8, -(-per_step // 8) * 8)
    grid = (pl.cdiv(B, tb),)

    const = lambda i: (0, 0)     # weights/biases/mean stay resident in VMEM
    actor, value = pl.pallas_call(
        _mlp_base_kernel,
        out_shape=(jax.ShapeDtypeStruct((B, hidden), jnp.float32),
                   jax.ShapeDtypeStruct((B, 1), jnp.float32)),
        grid=grid,
        in_specs=[
            pl.BlockSpec((tb, din), lambda i: (i, 0)),   # inputs, tiled on batch
            pl.BlockSpec((1, din), const),               # Normalizer mean (f32)
            pl.BlockSpec((din, h2), const),              # fused W1 (inv_std folded)
            pl.BlockSpec((1, h2), const),                # fused b1
            pl.BlockSpec((h2, h2), const),               # fused W2 (block-diag)
            pl.BlockSpec((1, h2), const),                # fused b2
            pl.BlockSpec((1, h2), const),                # value-head row weights
            pl.BlockSpec(memory_space=pltpu.MemorySpace.SMEM),  # value-head bias
        ],
        out_specs=(pl.BlockSpec((tb, hidden), lambda i: (i, 0)),
                   pl.BlockSpec((tb, 1), lambda i: (i, 0))),
        compiler_params=pltpu.CompilerParams(
            dimension_semantics=("parallel",),           # megacore on v7x
            vmem_limit_bytes=32 * 1024 * 1024),          # headroom for tb=4096
    )(inputs, fused["mean"], fused["w1"], fused["b1"], fused["w2"],
      fused["b2"], fused["vw"], fused["vb"])

    return value, actor, rnn_hxs


def init_params(key, num_inputs, hidden_size=64):
    """Mirror MLPBase.__init__: orthogonal(gain=sqrt(2)) weights, zero biases,
    Normalizer mean=0 / std=1. Weights stored (in, out) so forward is x @ W."""
    ortho = jax.nn.initializers.orthogonal(scale=math.sqrt(2))
    ks = jax.random.split(key, 5)

    def linear_w(k, in_f, out_f):
        # torch Linear weight is (out, in); store transposed for x @ W.
        return ortho(k, (out_f, in_f), jnp.float32).T

    return {
        "mean": jnp.zeros((1, num_inputs), jnp.float32),
        "std": jnp.ones((1, num_inputs), jnp.float32),
        "actor_w1": linear_w(ks[0], num_inputs, hidden_size),
        "actor_b1": jnp.zeros((1, hidden_size), jnp.float32),
        "actor_w2": linear_w(ks[1], hidden_size, hidden_size),
        "actor_b2": jnp.zeros((1, hidden_size), jnp.float32),
        "critic_w1": linear_w(ks[2], num_inputs, hidden_size),
        "critic_b1": jnp.zeros((1, hidden_size), jnp.float32),
        "critic_w2": linear_w(ks[3], hidden_size, hidden_size),
        "critic_b2": jnp.zeros((1, hidden_size), jnp.float32),
        "critic_linear_w": linear_w(ks[4], hidden_size, 1),
        "critic_linear_b": jnp.zeros((1, 1), jnp.float32),
    }


def mlp_base_reference(inputs, rnn_hxs, masks, params):
    """Pure-JAX f32 reference of MLPBase.forward (non-recurrent)."""
    del masks
    x = (inputs - params["mean"]) / jnp.maximum(params["std"], EPS)
    ha = jax.nn.relu(x @ params["actor_w1"] + params["actor_b1"])
    ha = jax.nn.relu(ha @ params["actor_w2"] + params["actor_b2"])
    hc = jax.nn.relu(x @ params["critic_w1"] + params["critic_b1"])
    hc = jax.nn.relu(hc @ params["critic_w2"] + params["critic_b2"])
    value = hc @ params["critic_linear_w"] + params["critic_linear_b"]
    return value, ha, rnn_hxs


if __name__ == "__main__":
    key = jax.random.PRNGKey(0)
    k_in, k_big, k_params, k_mean, k_std = jax.random.split(key, 5)

    num_inputs = 32
    hidden_size = 64
    params = init_params(k_params, num_inputs, hidden_size)
    fused = fuse_params(params)

    # --- small smoke test (B=8, single grid step) ---
    batch = 8
    inputs = jax.random.normal(k_in, (batch, num_inputs), jnp.float32)
    rnn_hxs = jnp.zeros((batch, 1), jnp.float32)   # non-recurrent: size-1 hxs pass-through
    masks = jnp.ones((batch, 1), jnp.float32)

    value, hidden_actor, rnn_hxs_out = mlp_base_forward(inputs, rnn_hxs, masks, fused)
    jax.block_until_ready((value, hidden_actor, rnn_hxs_out))

    assert value.shape == (batch, 1)
    assert hidden_actor.shape == (batch, hidden_size)
    assert rnn_hxs_out.shape == rnn_hxs.shape

    v_ref, a_ref, _ = mlp_base_reference(inputs, rnn_hxs, masks, params)
    # bf16 MXU operands -> loose tolerance vs the f32 reference.
    assert jnp.allclose(value, v_ref, atol=1e-1, rtol=1e-1)
    assert jnp.allclose(hidden_actor, a_ref, atol=1e-1, rtol=1e-1)

    # --- multi-tile grid (grid=2, partial last tile) + non-trivial Normalizer ---
    params["mean"] = 3.0 * jax.random.normal(k_mean, (1, num_inputs), jnp.float32)
    params["std"] = jax.random.uniform(k_std, (1, num_inputs), jnp.float32,
                                       minval=0.5, maxval=2.0)
    fused2 = fuse_params(params)

    big_b = 1030
    noise = jax.random.normal(k_big, (big_b, num_inputs), jnp.float32)
    big_inputs = params["mean"] + noise * params["std"]
    big_hxs = jnp.zeros((big_b, 1), jnp.float32)
    big_masks = jnp.ones((big_b, 1), jnp.float32)
    big_v, big_a, _ = mlp_base_forward(big_inputs, big_hxs, big_masks, fused2)
    jax.block_until_ready((big_v, big_a))

    assert big_v.shape == (big_b, 1) and big_a.shape == (big_b, hidden_size)
    bv_ref, ba_ref, _ = mlp_base_reference(big_inputs, big_hxs, big_masks, params)
    assert jnp.allclose(big_v, bv_ref, atol=1e-1, rtol=1e-1)
    assert jnp.allclose(big_a, ba_ref, atol=1e-1, rtol=1e-1)

    print("KERNEL_OK")
</pallas_src>

<mosaic_0001>
module attributes {stable_mosaic.version = 11 : i64} {
  func.func @_mlp_base_kernel(%arg0: i32, %arg1: memref<8x32xf32, #tpu.memory_space<vmem>>, %arg2: memref<1x32xf32, #tpu.memory_space<vmem>>, %arg3: memref<32x128xbf16, #tpu.memory_space<vmem>>, %arg4: memref<1x128xf32, #tpu.memory_space<vmem>>, %arg5: memref<128x128xbf16, #tpu.memory_space<vmem>>, %arg6: memref<1x128xf32, #tpu.memory_space<vmem>>, %arg7: memref<1x128xf32, #tpu.memory_space<vmem>>, %arg8: memref<1x1xf32, #tpu.memory_space<smem>>, %arg9: memref<8x64xf32, #tpu.memory_space<vmem>>, %arg10: memref<8x1xf32, #tpu.memory_space<vmem>>) attributes {dimension_semantics = [#tpu.dimension_semantics<parallel>], iteration_bounds = array<i64: 1>, scalar_prefetch = 0 : i64, scratch_operands = 0 : i64, tpu.core_type = #tpu.core_type<tc>, window_params = [{transform_indices = @transform_0, window_bounds = array<i64: 8, 32>}, {pipeline_mode = #tpu.pipeline_mode<synchronous>, transform_indices = @transform_1, window_bounds = array<i64: 1, 32>}, {pipeline_mode = #tpu.pipeline_mode<synchronous>, transform_indices = @transform_2, window_bounds = array<i64: 32, 128>}, {pipeline_mode = #tpu.pipeline_mode<synchronous>, transform_indices = @transform_3, window_bounds = array<i64: 1, 128>}, {pipeline_mode = #tpu.pipeline_mode<synchronous>, transform_indices = @transform_4, window_bounds = array<i64: 128, 128>}, {pipeline_mode = #tpu.pipeline_mode<synchronous>, transform_indices = @transform_5, window_bounds = array<i64: 1, 128>}, {pipeline_mode = #tpu.pipeline_mode<synchronous>, transform_indices = @transform_6, window_bounds = array<i64: 1, 128>}, {transform_indices = @transform_7, window_bounds = array<i64: 1, 1>}, {transform_indices = @transform_8, window_bounds = array<i64: 8, 64>}, {transform_indices = @transform_9, window_bounds = array<i64: 8, 1>}]} {
    %c0 = arith.constant 0 : index
    %c0_0 = arith.constant 0 : index
    %0 = vector.load %arg1[%c0, %c0_0] : memref<8x32xf32, #tpu.memory_space<vmem>>, vector<8x32xf32>
    %c0_1 = arith.constant 0 : index
    %c0_2 = arith.constant 0 : index
    %1 = vector.load %arg2[%c0_1, %c0_2] : memref<1x32xf32, #tpu.memory_space<vmem>>, vector<1x32xf32>
    %2 = vector.broadcast %1 : vector<1x32xf32> to vector<8x32xf32>
    %3 = arith.subf %0, %2 : vector<8x32xf32>
    %4 = arith.truncf %3 : vector<8x32xf32> to vector<8x32xbf16>
    %c0_3 = arith.constant 0 : index
    %c0_4 = arith.constant 0 : index
    %5 = vector.load %arg3[%c0_3, %c0_4] : memref<32x128xbf16, #tpu.memory_space<vmem>>, vector<32x128xbf16>
    %cst = arith.constant dense<0.000000e+00> : vector<8x128xf32>
    %6 = tpu.matmul %4, %5, %cst {dimension_numbers = #tpu.dot_dimension_numbers<[1], [0], [0], [1], [0, 0, 1, 1], [], []>} : vector<8x32xbf16>, vector<32x128xbf16>, vector<8x128xf32> -> vector<8x128xf32>
    %c0_5 = arith.constant 0 : index
    %c0_6 = arith.constant 0 : index
    %7 = vector.load %arg4[%c0_5, %c0_6] : memref<1x128xf32, #tpu.memory_space<vmem>>, vector<1x128xf32>
    %8 = vector.broadcast %7 : vector<1x128xf32> to vector<8x128xf32>
    %9 = arith.addf %6, %8 : vector<8x128xf32>
    %cst_7 = arith.constant 0.000000e+00 : f32
    %10 = vector.broadcast %cst_7 : f32 to vector<8x128xf32>
    %11 = arith.maximumf %9, %10 : vector<8x128xf32>
    %12 = arith.truncf %11 : vector<8x128xf32> to vector<8x128xbf16>
    %c0_8 = arith.constant 0 : index
    %c0_9 = arith.constant 0 : index
    %13 = vector.load %arg5[%c0_8, %c0_9] : memref<128x128xbf16, #tpu.memory_space<vmem>>, vector<128x128xbf16>
    %cst_10 = arith.constant dense<0.000000e+00> : vector<8x128xf32>
    %14 = tpu.matmul %12, %13, %cst_10 {dimension_numbers = #tpu.dot_dimension_numbers<[1], [0], [0], [1], [0, 0, 1, 1], [], []>} : vector<8x128xbf16>, vector<128x128xbf16>, vector<8x128xf32> -> vector<8x128xf32>
    %c0_11 = arith.constant 0 : index
    %c0_12 = arith.constant 0 : index
    %15 = vector.load %arg6[%c0_11, %c0_12] : memref<1x128xf32, #tpu.memory_space<vmem>>, vector<1x128xf32>
    %16 = vector.broadcast %15 : vector<1x128xf32> to vector<8x128xf32>
    %17 = arith.addf %14, %16 : vector<8x128xf32>
    %cst_13 = arith.constant 0.000000e+00 : f32
    %18 = vector.broadcast %cst_13 : f32 to vector<8x128xf32>
    %19 = arith.maximumf %17, %18 : vector<8x128xf32>
    %20 = vector.extract_strided_slice %19 {offsets = [0, 0], sizes = [8, 64], strides = [1, 1]} : vector<8x128xf32> to vector<8x64xf32>
    %c0_14 = arith.constant 0 : index
    %c0_15 = arith.constant 0 : index
    %21 = vector.load %arg9[%c0_14, %c0_15] : memref<8x64xf32, #tpu.memory_space<vmem>>, vector<8x64xf32>
    tpu.vector_store %arg9[%c0_14, %c0_15], %20 {strides = array<i32>} : memref<8x64xf32, #tpu.memory_space<vmem>>, vector<8x64xf32>,
    %c0_16 = arith.constant 0 : index
    %c0_17 = arith.constant 0 : index
    %22 = vector.load %arg7[%c0_16, %c0_17] : memref<1x128xf32, #tpu.memory_space<vmem>>, vector<1x128xf32>
    %23 = vector.broadcast %22 : vector<1x128xf32> to vector<8x128xf32>
    %24 = arith.mulf %19, %23 : vector<8x128xf32>
    %cst_18 = arith.constant dense<0.000000e+00> : vector<8xf32>
    %25 = vector.multi_reduction <add>, %24, %cst_18 [1] : vector<8x128xf32> to vector<8xf32>
    %26 = vector.shape_cast %25 : vector<8xf32> to vector<8x1xf32>
    %c0_19 = arith.constant 0 : index
    %c0_20 = arith.constant 0 : index
    %27 = memref.load %arg8[%c0_19, %c0_20] : memref<1x1xf32, #tpu.memory_space<smem>>
    %28 = vector.broadcast %27 : f32 to vector<8x1xf32>
    %29 = arith.addf %26, %28 : vector<8x1xf32>
    %c0_21 = arith.constant 0 : index
    %c0_22 = arith.constant 0 : index
    %30 = vector.load %arg10[%c0_21, %c0_22] : memref<8x1xf32, #tpu.memory_space<vmem>>, vector<8x1xf32>
    tpu.vector_store %arg10[%c0_21, %c0_22], %29 {strides = array<i32>} : memref<8x1xf32, #tpu.memory_space<vmem>>, vector<8x1xf32>,
    return
  }
  func.func @transform_0(%arg0: i32) -> (i32, i32) {
    %c0_i32 = arith.constant 0 : i32
    %c0_i32_0 = arith.constant 0 : i32
    return %arg0, %c0_i32 : i32, i32
  }
  func.func @transform_1(%arg0: i32) -> (i32, i32) {
    %c0_i32 = arith.constant 0 : i32
    %c0_i32_0 = arith.constant 0 : i32
    %c0_i32_1 = arith.constant 0 : i32
    return %c0_i32, %c0_i32_0 : i32, i32
  }
  func.func @transform_2(%arg0: i32) -> (i32, i32) {
    %c0_i32 = arith.constant 0 : i32
    %c0_i32_0 = arith.constant 0 : i32
    %c0_i32_1 = arith.constant 0 : i32
    return %c0_i32, %c0_i32_0 : i32, i32
  }
  func.func @transform_3(%arg0: i32) -> (i32, i32) {
    %c0_i32 = arith.constant 0 : i32
    %c0_i32_0 = arith.constant 0 : i32
    %c0_i32_1 = arith.constant 0 : i32
    return %c0_i32, %c0_i32_0 : i32, i32
  }
  func.func @transform_4(%arg0: i32) -> (i32, i32) {
    %c0_i32 = arith.constant 0 : i32
    %c0_i32_0 = arith.constant 0 : i32
    %c0_i32_1 = arith.constant 0 : i32
    return %c0_i32, %c0_i32_0 : i32, i32
  }
  func.func @transform_5(%arg0: i32) -> (i32, i32) {
    %c0_i32 = arith.constant 0 : i32
    %c0_i32_0 = arith.constant 0 : i32
    %c0_i32_1 = arith.constant 0 : i32
    return %c0_i32, %c0_i32_0 : i32, i32
  }
  func.func @transform_6(%arg0: i32) -> (i32, i32) {
    %c0_i32 = arith.constant 0 : i32
    %c0_i32_0 = arith.constant 0 : i32
    %c0_i32_1 = arith.constant 0 : i32
    return %c0_i32, %c0_i32_0 : i32, i32
  }
  func.func @transform_7(%arg0: i32) -> (i32, i32) {
    %c0_i32 = arith.constant 0 : i32
    %c0_i32_0 = arith.constant 0 : i32
    %c0_i32_1 = arith.constant 0 : i32
    return %c0_i32, %c0_i32_0 : i32, i32
  }
  func.func @transform_8(%arg0: i32) -> (i32, i32) {
    %c0_i32 = arith.constant 0 : i32
    %c0_i32_0 = arith.constant 0 : i32
    return %arg0, %c0_i32 : i32, i32
  }
  func.func @transform_9(%arg0: i32) -> (i32, i32) {
    %c0_i32 = arith.constant 0 : i32
    %c0_i32_0 = arith.constant 0 : i32
    return %arg0, %c0_i32 : i32, i32
  }
}

</mosaic_0001>

<bundles_post_ra>
// kernel: mlp_base_forward.1
= control target key start
LH: loop header
LB: loop body
LE: loop exit
PB: predicated region body
PF: predicated region fallthrough
CT: control target
= control target key end

     0   :  { %16 = vsyncpa [#allocation4], 0  ;;  %s598_s0 = inlined_call_operand.hbm [shape: f32[8,32], index: 0, kind: input, shape index: {}]   ;;  %s599_s1 = inlined_call_operand.vmem [shape: f32[1,32], index: 1, kind: input, shape index: {}]   ;;  %s600_s2 = inlined_call_operand.hbm [shape: bf16[32,128], index: 2, kind: input, shape index: {}]   ;;  %s601_s3 = inlined_call_operand.vmem [shape: f32[1,128], index: 3, kind: input, shape index: {}]   ;;  %s602_s4 = inlined_call_operand.hbm [shape: bf16[128,128], index: 4, kind: input, shape index: {}]   ;;  %s603_s5 = inlined_call_operand.vmem [shape: f32[1,128], index: 5, kind: input, shape index: {}]   ;;  %s604_s6 = inlined_call_operand.vmem [shape: f32[1,128], index: 6, kind: input, shape index: {}]   ;;  %s605_s7 = inlined_call_operand.<no memory space> [shape: f32[1,1], index: 7, kind: input, shape index: {}]   ;;  %s606_s8 = inlined_call_operand.hbm [shape: f32[8,64], index: 8, kind: output, shape index: {0}]   ;;  %s607_s9 = inlined_call_operand.vmem [shape: f32[8,1], index: 9, kind: output, shape index: {1}]  }
   0x1   :  { %17 = vsyncpa [#allocation7], 0 }
   0x2   :  { %18 = vsyncpa [#allocation5], 0  ;;  %s468_s30 = smov [#allocation6]   ;;  %s374_s13 = scalar_lea.hbm %s600_s2, 256 }
   0x3   :  { %s36_s10 = sshll.u32 %s468_s30, 4  ;;  %p375_p0 = scmp.ne.s32.totalorder %s600_s2, %s374_s13  ;;  %s37_s10 = int_to_ptr.vmem [resolvable:$true] %s36_s10 }
   0x4   :  { %p378_p1 = scmp.lt.u32.totalorder %s374_s13, %s600_s2 }
   0x6   :  { %p380_p2 = pnand %p378_p1, %p375_p0 }
   0x8   :  { %383 = shalt.err (!%p380_p2)
}
   0x9   :  { %s384_s18 = scalar_lea.vmem %s37_s10, 256  ;;  %p389_p4 = scmp.lt.s32.totalorder %s37_s10, %s37_s10 }
   0xa   :  { %p385_p3 = scmp.ne.s32.totalorder %s37_s10, %s384_s18  ;;  %p390_p5 = scmp.lt.s32.totalorder %s384_s18, %s384_s18 }
   0xc   :  { %p391_p6 = por %p390_p5, %p389_p4 }
   0xe   :  { %p392_p7 = pnand %p391_p6, %p385_p3 }
  0x10   :  { %395 = shalt.err (!%p392_p7)
}
  0x11   :  { %s469_s19 = smov 64   ;;  %s470_s20 = smov 4  }
  0x12   :  { %42 = dma.hbm_to_vmem [thread:$0]  %s600_s2, 256, %s37_s10, [#allocation7], %s469_s19, %s469_s19, %s470_s20  }
  0x13   :  { %s471_s23 = smov [#allocation3]   ;;  %s472_s25 = smov [#allocation8]  }
  0x14   :  { %s25_s24 = sshll.u32 %s471_s23, 4  ;;  %s50_s26 = sshll.u32 %s472_s25, 4  ;;  %s26_s24 = int_to_ptr.vmem [resolvable:$true] %s25_s24  ;;  %s51_s26 = int_to_ptr.vmem [resolvable:$true] %s50_s26 }
  0x15   :  { %s396_s29 = scalar_lea.hbm %s598_s0, 128 }
  0x16   :  { %p397_p8 = scmp.ne.s32.totalorder %s598_s0, %s396_s29  ;;  %p400_p9 = scmp.lt.u32.totalorder %s396_s29, %s598_s0 }
  0x18   :  { %p402_p10 = pnand %p400_p9, %p397_p8 }
  0x1a   :  { %405 = shalt.err (!%p402_p10)
}
  0x1b   :  { %s406_s2 = scalar_lea.vmem %s26_s24, 128  ;;  %p411_p12 = scmp.lt.s32.totalorder %s26_s24, %s26_s24 }
  0x1c   :  { %p407_p11 = scmp.ne.s32.totalorder %s26_s24, %s406_s2  ;;  %p412_p13 = scmp.lt.s32.totalorder %s406_s2, %s406_s2 }
  0x1e   :  { %p413_p0 = por %p412_p13, %p411_p12 }
  0x20   :  { %p414_p1 = pnand %p413_p0, %p407_p11 }
  0x22   :  { %417 = shalt.err (!%p414_p1)
}
  0x23   :  { %28 = dma.hbm_to_vmem [thread:$0]  %s598_s0, 128, %s26_s24, [#allocation4]  }
  0x24   :  { %s418_s17 = scalar_lea.hbm %s602_s4, 1024 }
  0x25   :  { %p419_p2 = scmp.ne.s32.totalorder %s602_s4, %s418_s17  ;;  %p422_p3 = scmp.lt.u32.totalorder %s418_s17, %s602_s4 }
  0x27   :  { %p424_p4 = pnand %p422_p3, %p419_p2 }
  0x29   :  { %427 = shalt.err (!%p424_p4)
}
  0x2a   :  { %s428_s25 = scalar_lea.vmem %s51_s26, 1024  ;;  %p433_p6 = scmp.lt.s32.totalorder %s51_s26, %s51_s26 }
  0x2b   :  { %p429_p5 = scmp.ne.s32.totalorder %s51_s26, %s428_s25  ;;  %p434_p7 = scmp.lt.s32.totalorder %s428_s25, %s428_s25 }
  0x2d   :  { %p435_p8 = por %p434_p7, %p433_p6 }
  0x2f   :  { %p436_p9 = pnand %p435_p8, %p429_p5 }
  0x31   :  { %439 = shalt.err (!%p436_p9)
}
  0x32   :  { %56 = dma.hbm_to_vmem [thread:$0]  %s602_s4, 1024, %s51_s26, [#allocation7], %s469_s19, %s469_s19, %s470_s20  }
  0x33   :  { %462 = dma.done.wait [#allocation4], 128  }
  0x34   :  { %463 = vsyncadd [#allocation4], 4294967168 }
  0x35   :  { %464 = dma.done.wait [#allocation7], 1280  }
  0x36   :  { %465 = vsyncadd [#allocation7], 4294966016  ;;  %v473_v0 = vmov 0.0   ;;  %vm474_vm0 = vmmov 0   ;;  %v364_v1 = vld [vmem:[#allocation6] sm:$0xff]   ;;  %v365_v2 = vld [vmem:[#allocation6 + $0x8] sm:$0xff]  }
  0x37   :  { %328 = vmatprep.subr.bf16.mxu0 %v473_v0  ;;  %332 = vmatprep.mubr.msk.bf16.mxu0 %vm474_vm0, %v473_v0  ;;  %v73_v3 = vld [vmem:[#allocation3] sm:$0xff]  ;;  %v366_v6 = vld [vmem:[#allocation8] sm:$0xff]   ;;  %vm106_vm1 = vcmask 261120   ;;  %v368_v9 = vld [vmem:[#allocation8 + $0x10] sm:$0xff]   ;;  %vm264_vm2 = vcmask 523264  }
  0x38   :  { %336 = vmatprep.subr.bf16.mxu1 %v473_v0  ;;  %352 = vmatprep.mubr.msk.bf16.mxu1 %vm474_vm0, %v473_v0  ;;  %v301_v4 = vld [vmem:[%s599_s1] ss:$0 sm:$0xff]  ;;  %v369_v10 = vld [vmem:[#allocation8 + $0x18] sm:$0xff]   ;;  %v370_v11 = vld [vmem:[#allocation8 + $0x20] sm:$0xff]  }
  0x39   :  { %329 = vmatpush3.bf16.msra.mxu0 %v364_v1  ;;  %v81_v5 = vsub.f32 %v73_v3, %v301_v4  ;;  %337 = vmatpush3.bf16.msra.mxu1 %v366_v6  ;;  %v367_v8 = vld [vmem:[#allocation8 + $0x8] sm:$0xff]   ;;  %v372_v13 = vld [vmem:[#allocation8 + $0x30] sm:$0xff]   ;;  %v373_v14 = vld [vmem:[#allocation8 + $0x38] sm:$0xff]  }
  0x3a   :  { %330 = vmatprep.subr.bf16.mxu0 %v473_v0  ;;  %338 = vmatprep.subr.bf16.mxu1 %v473_v0  ;;  %v371_v12 = vld [vmem:[#allocation8 + $0x28] sm:$0xff]  }
  0x3b   :  { %v82_v7 = vpack.c.bf16 %v81_v5, %v81_v5  ;;  %v302_v15 = vld [vmem:[%s601_s3] ss:$0 sm:$0xff]  ;;  %s475_s3 = smov [#allocation9]  }
  0x3c   :  { %v306_v23 = vld [vmem:[%s603_s5] ss:$0 sm:$0xff]  ;;  %s287_s30 = sshll.u32 %s475_s3, 4  ;;  %s288_s30 = int_to_ptr.vmem [resolvable:$true] %s287_s30 }
  0x3d   :  { %331 = vmatpush3.bf16.msra.mxu0 %v365_v2  ;;  %339 = vmatpush3.bf16.msra.mxu1 %v367_v8  ;;  %v315_v28 = vld [vmem:[%s604_s6] ss:$0 sm:$0xff]  ;;  %s440_s11 = scalar_lea.vmem %s288_s30, 128  ;;  %p445_p11 = scmp.lt.s32.totalorder %s288_s30, %s288_s30 }
  0x3e   :  { %340 = vmatprep.subr.bf16.mxu1 %v473_v0  ;;  %p441_p10 = scmp.ne.s32.totalorder %s288_s30, %s440_s11  ;;  %p446_p12 = scmp.lt.s32.totalorder %s440_s11, %s440_s11 }
  0x40   :  { %333 = vmatmul.mubr.msk.bf16.vlgmr.msra.gmra.mrb[0].mxu0 %vm106_vm1, %v82_v7  ;;  %p447_p13 = por %p446_p12, %p445_p11 }
  0x41   :  { %341 = vmatpush3.bf16.msra.mxu1 %v368_v9 }
  0x42   :  { %342 = vmatprep.subr.bf16.mxu1 %v473_v0  ;;  %p448_p0 = pnand %p447_p13, %p441_p10 }
  0x45   :  { %343 = vmatpush3.bf16.msra.mxu1 %v369_v10 }
  0x46   :  { %344 = vmatprep.subr.bf16.mxu1 %v473_v0 }
  0x49   :  { %345 = vmatpush3.bf16.msra.mxu1 %v370_v11 }
  0x4a   :  { %346 = vmatprep.subr.bf16.mxu1 %v473_v0 }
  0x4d   :  { %347 = vmatpush3.bf16.msra.mxu1 %v371_v12 }
  0x4e   :  { %348 = vmatprep.subr.bf16.mxu1 %v473_v0 }
  0x51   :  { %349 = vmatpush3.bf16.msra.mxu1 %v372_v13 }
  0x52   :  { %350 = vmatprep.subr.bf16.mxu1 %v473_v0 }
  0x55   :  { %351 = vmatpush3.bf16.msra.mxu1 %v373_v14 }
 0x113   :  { %v144_v16 = vpop.f32.mrb[0].mxu0 }
 0x114   :  { %v145_v17 = vadd.f32 %v302_v15, %v144_v16  ;;  %v334_v18 = vpop.f32.mrb[1].mxu0 }
 0x115   :  { %v147_v19 = vpop.f32.mrb[2].mxu0 }
 0x116   :  { %v150_v20 = vmax.f32 %v145_v17, 0.0  ;;  %v335_v21 = vpop.f32.mrb[3].mxu0 }
 0x118   :  { %v151_v22 = vpack.c.bf16 %v150_v20, %v150_v20 }
 0x11a   :  { %353 = vmatmul.mubr.bf16.vlgmr.msra.gmra.mrb[0].mxu1 %v151_v22 }
 0x1ed   :  { %v257_v24 = vpop.f32.mrb[0].mxu1 }
 0x1ee   :  { %v258_v25 = vadd.f32 %v306_v23, %v257_v24  ;;  %v354_v26 = vpop.f32.mrb[1].mxu1 }
 0x1ef   :  { %v260_v27 = vpop.f32.mrb[2].mxu1 }
 0x1f0   :  { %v263_v29 = vmax.f32 %v258_v25, 0.0  ;;  %v355_v30 = vpop.f32.mrb[3].mxu1 }
 0x1f2   :  { %v273_v31 = vmul.f32 %v315_v28, %v263_v29  ;;  %265 = vst.msk [vmem:[#allocation9] sm:$0xff] %vm264_vm2, %v263_v29 }
 0x1f4   :  { %274 = vadd.xlane.f32.xlu0 %v273_v31 }
 0x1f5   :  { %451 = shalt.err (!%p448_p0)
}
 0x1f6   :  { %s452_s6 = scalar_lea.hbm %s606_s8, 128 }
 0x1f7   :  { %p453_p1 = scmp.ne.s32.totalorder %s606_s8, %s452_s6  ;;  %p456_p2 = scmp.lt.u32.totalorder %s452_s6, %s606_s8 }
 0x1f9   :  { %p458_p3 = pnand %p456_p2, %p453_p1 }
 0x1fb   :  { %461 = shalt.err (!%p458_p3)
}
 0x1fc   :  { %290 = dma.vmem_to_hbm [thread:$0]  %s288_s30, 128, %s606_s8, [#allocation5]   ;;  %v277_v32 = vstv %s605_s7  ;;  %vm279_vm3 = vcmask 7168  }
 0x281   :  { %v275_v33 = vpop.xlane.xlu0 %274 }
 0x282   :  { %v278_v34 = vadd.f32 %v277_v32, %v275_v33 }
 0x284   :  { %280 = vst.msk [vmem:[%s607_s9] sm:$0xff] %vm279_vm3, %v278_v34 }
 0x285   :  { %466 = dma.done.wait [#allocation5], 128  }
 0x286   :  { %467 = vsyncadd [#allocation5], 4294967168 }
 0x287   :  { %298 = vsyncpa [#allocation4], 1 }
 0x288   :  { %299 = vsyncpa [#allocation7], 1 }
 0x289   :  { %300 = vsyncpa [#allocation5], 1 }

</bundles_post_ra>
